<compile_context>
chip_gen: v6e
topology: v6e:2x2x1
jax: 0.10.0
libtpu: 0.0.40
codegen_flags: <defaults>
</compile_context>

<pallas_src>
import functools

import jax
import jax.numpy as jnp
from jax.experimental import pallas as pl
from jax.experimental.pallas import tpu as pltpu

NEG_SLOPE = 0.01          # PyTorch nn.LeakyReLU default
H1, H2 = 128, 64          # hidden widths
COMPUTE_DTYPE = jnp.bfloat16


def _leaky_relu(x):
    return jnp.where(x > 0, x, NEG_SLOPE * x)


def _round_up(n, m):
    return ((n + m - 1) // m) * m


def spam_mlp_kernel(x_ref, w1_ref, b1_ref, w2_ref, b2_ref, w3_ref, b3_ref, o_ref):
    # fc1 + LeakyReLU. x arrives f32; cast to bf16 in-kernel (VPU, hidden under
    # the input DMA) so the MXU runs its native bf16 path with f32 accumulation.
    x = x_ref[...].astype(COMPUTE_DTYPE)
    h1 = jnp.dot(x, w1_ref[...], preferred_element_type=jnp.float32)
    h1 = _leaky_relu(h1 + b1_ref[...])

    # fc2 + LeakyReLU
    h2 = jnp.dot(h1.astype(COMPUTE_DTYPE), w2_ref[...],
                 preferred_element_type=jnp.float32)
    h2 = _leaky_relu(h2 + b2_ref[...])

    # fc3: contract the 64 hidden features with the batch on the lane (N) axis:
    #   scores = w3 (8, 64) . h2 (TB, 64)^T -> (8, TB)   (q @ k^T pattern)
    # w3 is zero-padded to 8 sublane rows (full sublane tile); row 0 is real.
    s = jax.lax.dot_general(
        w3_ref[...], h2.astype(COMPUTE_DTYPE),
        dimension_numbers=(((1,), (1,)), ((), ())),
        preferred_element_type=jnp.float32)

    # Bias + sigmoid only on the real row -> (1, TB) lane-dense f32 store.
    o_ref[...] = jax.nn.sigmoid(s[0:1, :] + b3_ref[0])


@functools.partial(jax.jit, static_argnames=("block_b",))
def spam_detection_forward(x, params, block_b=2048):
    """x: (B, input_size) f32. params: output of prepare_params()."""
    B, F = x.shape

    w1, b1 = params["w1"], params["b1"]
    w2, b2 = params["w2"], params["b2"]
    w3, b3 = params["w3"], params["b3"]

    # Batch tiling. Multi-block tiles must be 128-multiples so the (1, TB)
    # output block stays lane-dense; single-block case uses the full-dim rule.
    block_b = max(128, _round_up(block_b, 128))
    TB = min(block_b, _round_up(B, 8))
    B_pad = _round_up(B, TB)
    x_p = x if B_pad == B else jnp.pad(x, ((0, B_pad - B), (0, 0)))  # ragged tail only
    grid = (B_pad // TB,)

    const = lambda shape: pl.BlockSpec(shape, lambda i: (0, 0))  # resident weights

    cost = pl.CostEstimate(
        flops=2 * B_pad * (F * H1 + H1 * H2 + H2),
        transcendentals=B_pad,  # one sigmoid per row
        bytes_accessed=(x_p.size * 4
                        + (w1.size + w2.size + w3.size) * 2
                        + (b1.size + b2.size) * 4 + 4
                        + B_pad * 4),
    )

    out = pl.pallas_call(
        spam_mlp_kernel,
        out_shape=jax.ShapeDtypeStruct((1, B_pad), jnp.float32),
        grid=grid,
        in_specs=[
            pl.BlockSpec((TB, F), lambda i: (i, 0)),   # x: tiled along batch (f32)
            const((F, H1)), const((1, H1)),            # fc1 weight/bias (resident)
            const((H1, H2)), const((1, H2)),           # fc2 weight/bias (resident)
            const((8, H2)),                            # fc3 rows (row 0 real)
            pl.BlockSpec(memory_space=pltpu.MemorySpace.SMEM),  # b3 scalar
        ],
        out_specs=pl.BlockSpec((1, TB), lambda i: (0, i)),  # lane-dense scores
        compiler_params=pltpu.CompilerParams(
            dimension_semantics=("parallel",),         # v7x: shard batch over 2 TCs
        ),
        cost_estimate=cost,
    )(x_p, w1, b1, w2, b2, w3, b3)

    # Kernel emits (1, B_pad) scores; real output is (B, 1) like PyTorch.
    return out[0, :B, None]


def init_params(key, input_size):
    """PyTorch-Linear-style U(-1/sqrt(fan_in), 1/sqrt(fan_in)) init.

    Raw f32 params: weights as (in, out) (transposed vs PyTorch), biases (1, out).
    """
    def linear(key, fan_in, fan_out):
        kw, kb = jax.random.split(key)
        bound = 1.0 / jnp.sqrt(jnp.float32(fan_in))
        w = jax.random.uniform(kw, (fan_in, fan_out), jnp.float32, -bound, bound)
        b = jax.random.uniform(kb, (1, fan_out), jnp.float32, -bound, bound)
        return w, b

    k1, k2, k3 = jax.random.split(key, 3)
    w1, b1 = linear(k1, input_size, H1)
    w2, b2 = linear(k2, H1, H2)
    w3, b3 = linear(k3, H2, 1)
    return {"w1": w1, "b1": b1, "w2": w2, "b2": b2, "w3": w3, "b3": b3}


def prepare_params(raw):
    """One-time (outside the jit'd forward) conversion into kernel layout."""
    w3_row = raw["w3"].reshape(1, H2)                              # (1, 64) = (out, in)
    w3_pad = jnp.zeros((8, H2), jnp.float32).at[0:1, :].set(w3_row)  # full sublane tile
    return {
        "w1": raw["w1"].astype(COMPUTE_DTYPE),   # (F, 128)  bf16
        "b1": raw["b1"],                         # (1, 128)  f32
        "w2": raw["w2"].astype(COMPUTE_DTYPE),   # (128, 64) bf16
        "b2": raw["b2"],                         # (1, 64)   f32
        "w3": w3_pad.astype(COMPUTE_DTYPE),      # (8, 64)   bf16 (row 0 real)
        "b3": raw["b3"].reshape(1),              # (1,)      f32 scalar (SMEM)
    }


def reference_forward(x, raw):
    """Pure-JAX reference applying the same bf16 rounding the kernel sees."""
    def bf(a):
        return a.astype(COMPUTE_DTYPE).astype(jnp.float32)

    hp = jax.lax.Precision.HIGHEST
    h1 = _leaky_relu(jnp.dot(bf(x), bf(raw["w1"]), precision=hp) + raw["b1"])
    h2 = _leaky_relu(jnp.dot(bf(h1), bf(raw["w2"]), precision=hp) + raw["b2"])
    h3 = jnp.dot(bf(h2), bf(raw["w3"]), precision=hp) + raw["b3"]
    return jax.nn.sigmoid(h3)


if __name__ == "__main__":
    key = jax.random.PRNGKey(0)
    k_x, k_x2, k_p = jax.random.split(key, 3)

    input_size = 32  # tabular spam-feature vector
    raw_params = init_params(k_p, input_size)
    params = prepare_params(raw_params)   # hoisted out of the forward path

    # Small-shape check (single grid step).
    x = jax.random.normal(k_x, (8, input_size), dtype=jnp.float32)
    out = jax.block_until_ready(spam_detection_forward(x, params))
    ref = reference_forward(x, raw_params)
    assert out.shape == (8, 1)
    assert jnp.allclose(out, ref, atol=5e-3, rtol=5e-3), "mismatch vs reference (B=8)"

    # Multi-tile check: default TB=2048, grid=3, ragged batch exercises padding.
    x2 = jax.random.normal(k_x2, (4100, input_size), dtype=jnp.float32)
    out2 = jax.block_until_ready(spam_detection_forward(x2, params))
    ref2 = reference_forward(x2, raw_params)
    assert out2.shape == (4100, 1)
    assert jnp.allclose(out2, ref2, atol=5e-3, rtol=5e-3), "mismatch vs reference (B=4100)"

    print("KERNEL_OK")
</pallas_src>

<mosaic_0001>
module attributes {stable_mosaic.version = 11 : i64} {
  func.func @spam_mlp_kernel(%arg0: i32, %arg1: memref<8x32xf32, #tpu.memory_space<vmem>>, %arg2: memref<32x128xbf16, #tpu.memory_space<vmem>>, %arg3: memref<1x128xf32, #tpu.memory_space<vmem>>, %arg4: memref<128x64xbf16, #tpu.memory_space<vmem>>, %arg5: memref<1x64xf32, #tpu.memory_space<vmem>>, %arg6: memref<8x64xbf16, #tpu.memory_space<vmem>>, %arg7: memref<1xf32, #tpu.memory_space<smem>>, %arg8: memref<1x8xf32, #tpu.memory_space<vmem>>) attributes {dimension_semantics = [#tpu.dimension_semantics<parallel>], iteration_bounds = array<i64: 1>, scalar_prefetch = 0 : i64, scratch_operands = 0 : i64, tpu.core_type = #tpu.core_type<tc>, window_params = [{transform_indices = @transform_0, window_bounds = array<i64: 8, 32>}, {pipeline_mode = #tpu.pipeline_mode<synchronous>, transform_indices = @transform_1, window_bounds = array<i64: 32, 128>}, {pipeline_mode = #tpu.pipeline_mode<synchronous>, transform_indices = @transform_2, window_bounds = array<i64: 1, 128>}, {pipeline_mode = #tpu.pipeline_mode<synchronous>, transform_indices = @transform_3, window_bounds = array<i64: 128, 64>}, {pipeline_mode = #tpu.pipeline_mode<synchronous>, transform_indices = @transform_4, window_bounds = array<i64: 1, 64>}, {pipeline_mode = #tpu.pipeline_mode<synchronous>, transform_indices = @transform_5, window_bounds = array<i64: 8, 64>}, {transform_indices = @transform_6, window_bounds = array<i64: 1>}, {transform_indices = @transform_7, window_bounds = array<i64: 1, 8>}]} {
    %c0 = arith.constant 0 : index
    %c0_0 = arith.constant 0 : index
    %0 = vector.load %arg1[%c0, %c0_0] : memref<8x32xf32, #tpu.memory_space<vmem>>, vector<8x32xf32>
    %1 = arith.truncf %0 : vector<8x32xf32> to vector<8x32xbf16>
    %c0_1 = arith.constant 0 : index
    %c0_2 = arith.constant 0 : index
    %2 = vector.load %arg2[%c0_1, %c0_2] : memref<32x128xbf16, #tpu.memory_space<vmem>>, vector<32x128xbf16>
    %cst = arith.constant dense<0.000000e+00> : vector<8x128xf32>
    %3 = tpu.matmul %1, %2, %cst {dimension_numbers = #tpu.dot_dimension_numbers<[1], [0], [0], [1], [0, 0, 1, 1], [], []>} : vector<8x32xbf16>, vector<32x128xbf16>, vector<8x128xf32> -> vector<8x128xf32>
    %c0_3 = arith.constant 0 : index
    %c0_4 = arith.constant 0 : index
    %4 = vector.load %arg3[%c0_3, %c0_4] : memref<1x128xf32, #tpu.memory_space<vmem>>, vector<1x128xf32>
    %5 = vector.broadcast %4 : vector<1x128xf32> to vector<8x128xf32>
    %6 = arith.addf %3, %5 : vector<8x128xf32>
    %cst_5 = arith.constant 0.000000e+00 : f32
    %7 = vector.broadcast %cst_5 : f32 to vector<8x128xf32>
    %8 = arith.cmpf ogt, %6, %7 : vector<8x128xf32>
    %cst_6 = arith.constant 0.00999999977 : f32
    %9 = vector.broadcast %cst_6 : f32 to vector<8x128xf32>
    %10 = arith.mulf %9, %6 : vector<8x128xf32>
    %11 = arith.select %8, %6, %10 : vector<8x128xi1>, vector<8x128xf32>
    %12 = arith.truncf %11 : vector<8x128xf32> to vector<8x128xbf16>
    %c0_7 = arith.constant 0 : index
    %c0_8 = arith.constant 0 : index
    %13 = vector.load %arg4[%c0_7, %c0_8] : memref<128x64xbf16, #tpu.memory_space<vmem>>, vector<128x64xbf16>
    %cst_9 = arith.constant dense<0.000000e+00> : vector<8x64xf32>
    %14 = tpu.matmul %12, %13, %cst_9 {dimension_numbers = #tpu.dot_dimension_numbers<[1], [0], [0], [1], [0, 0, 1, 1], [], []>} : vector<8x128xbf16>, vector<128x64xbf16>, vector<8x64xf32> -> vector<8x64xf32>
    %c0_10 = arith.constant 0 : index
    %c0_11 = arith.constant 0 : index
    %15 = vector.load %arg5[%c0_10, %c0_11] : memref<1x64xf32, #tpu.memory_space<vmem>>, vector<1x64xf32>
    %16 = vector.broadcast %15 : vector<1x64xf32> to vector<8x64xf32>
    %17 = arith.addf %14, %16 : vector<8x64xf32>
    %cst_12 = arith.constant 0.000000e+00 : f32
    %18 = vector.broadcast %cst_12 : f32 to vector<8x64xf32>
    %19 = arith.cmpf ogt, %17, %18 : vector<8x64xf32>
    %cst_13 = arith.constant 0.00999999977 : f32
    %20 = vector.broadcast %cst_13 : f32 to vector<8x64xf32>
    %21 = arith.mulf %20, %17 : vector<8x64xf32>
    %22 = arith.select %19, %17, %21 : vector<8x64xi1>, vector<8x64xf32>
    %c0_14 = arith.constant 0 : index
    %c0_15 = arith.constant 0 : index
    %23 = vector.load %arg6[%c0_14, %c0_15] : memref<8x64xbf16, #tpu.memory_space<vmem>>, vector<8x64xbf16>
    %24 = arith.truncf %22 : vector<8x64xf32> to vector<8x64xbf16>
    %cst_16 = arith.constant dense<0.000000e+00> : vector<8x8xf32>
    %25 = tpu.matmul %23, %24, %cst_16 {dimension_numbers = #tpu.dot_dimension_numbers<[1], [1], [0], [0], [0, 0, 1, 0], [], []>} : vector<8x64xbf16>, vector<8x64xbf16>, vector<8x8xf32> -> vector<8x8xf32>
    %26 = vector.extract_strided_slice %25 {offsets = [0, 0], sizes = [1, 8], strides = [1, 1]} : vector<8x8xf32> to vector<1x8xf32>
    %c0_17 = arith.constant 0 : index
    %27 = memref.load %arg7[%c0_17] : memref<1xf32, #tpu.memory_space<smem>>
    %28 = vector.broadcast %27 : f32 to vector<1x8xf32>
    %29 = arith.addf %26, %28 : vector<1x8xf32>
    %30 = arith.negf %29 : vector<1x8xf32>
    %31 = math.exp %30 : vector<1x8xf32>
    %cst_18 = arith.constant 1.000000e+00 : f32
    %32 = vector.broadcast %cst_18 : f32 to vector<1x8xf32>
    %33 = arith.addf %32, %31 : vector<1x8xf32>
    %34 = arith.divf %32, %33 : vector<1x8xf32>
    %c0_19 = arith.constant 0 : index
    %c0_20 = arith.constant 0 : index
    %35 = vector.load %arg8[%c0_19, %c0_20] : memref<1x8xf32, #tpu.memory_space<vmem>>, vector<1x8xf32>
    tpu.vector_store %arg8[%c0_19, %c0_20], %34 {strides = array<i32>} : memref<1x8xf32, #tpu.memory_space<vmem>>, vector<1x8xf32>,
    return
  }
  func.func @transform_0(%arg0: i32) -> (i32, i32) {
    %c0_i32 = arith.constant 0 : i32
    %c0_i32_0 = arith.constant 0 : i32
    return %arg0, %c0_i32 : i32, i32
  }
  func.func @transform_1(%arg0: i32) -> (i32, i32) {
    %c0_i32 = arith.constant 0 : i32
    %c0_i32_0 = arith.constant 0 : i32
    %c0_i32_1 = arith.constant 0 : i32
    return %c0_i32, %c0_i32_0 : i32, i32
  }
  func.func @transform_2(%arg0: i32) -> (i32, i32) {
    %c0_i32 = arith.constant 0 : i32
    %c0_i32_0 = arith.constant 0 : i32
    %c0_i32_1 = arith.constant 0 : i32
    return %c0_i32, %c0_i32_0 : i32, i32
  }
  func.func @transform_3(%arg0: i32) -> (i32, i32) {
    %c0_i32 = arith.constant 0 : i32
    %c0_i32_0 = arith.constant 0 : i32
    %c0_i32_1 = arith.constant 0 : i32
    return %c0_i32, %c0_i32_0 : i32, i32
  }
  func.func @transform_4(%arg0: i32) -> (i32, i32) {
    %c0_i32 = arith.constant 0 : i32
    %c0_i32_0 = arith.constant 0 : i32
    %c0_i32_1 = arith.constant 0 : i32
    return %c0_i32, %c0_i32_0 : i32, i32
  }
  func.func @transform_5(%arg0: i32) -> (i32, i32) {
    %c0_i32 = arith.constant 0 : i32
    %c0_i32_0 = arith.constant 0 : i32
    %c0_i32_1 = arith.constant 0 : i32
    return %c0_i32, %c0_i32_0 : i32, i32
  }
  func.func @transform_6(%arg0: i32) -> i32 {
    %c0_i32 = arith.constant 0 : i32
    %c0_i32_0 = arith.constant 0 : i32
    return %c0_i32 : i32
  }
  func.func @transform_7(%arg0: i32) -> (i32, i32) {
    %c0_i32 = arith.constant 0 : i32
    %c0_i32_0 = arith.constant 0 : i32
    return %c0_i32, %arg0 : i32, i32
  }
}

</mosaic_0001>

<bundles_post_ra>
// kernel: spam_detection_forward.1
= control target key start
LH: loop header
LB: loop body
LE: loop exit
PB: predicated region body
PF: predicated region fallthrough
CT: control target
= control target key end

     0   :  { %v392_v1 = vmov 0.0   ;;  %vm393_vm0 = vmmov 0   ;;  %vm54_vm1 = vcmask 261120   ;;  %s486_s0 = inlined_call_operand.vmem [shape: f32[8,32], index: 0, kind: input, shape index: {}]   ;;  %s487_s1 = inlined_call_operand.vmem [shape: bf16[32,128], index: 1, kind: input, shape index: {}]   ;;  %s488_s2 = inlined_call_operand.vmem [shape: f32[1,128], index: 2, kind: input, shape index: {}]   ;;  %s489_s3 = inlined_call_operand.vmem [shape: bf16[128,64], index: 3, kind: input, shape index: {}]   ;;  %s490_s4 = inlined_call_operand.vmem [shape: f32[1,64], index: 4, kind: input, shape index: {}]   ;;  %s491_s5 = inlined_call_operand.vmem [shape: bf16[8,64], index: 5, kind: input, shape index: {}]   ;;  %s492_s6 = inlined_call_operand.<no memory space> [shape: f32[1], index: 6, kind: input, shape index: {}]   ;;  %s493_s7 = inlined_call_operand.hbm [shape: f32[1,8], index: 7, kind: output, shape index: {}]  }
   0x1   :  { %v356_v0 = vld [vmem:[%s487_s1 + $0x8] sm:$0xff]   ;;  %319 = vmatprep.subr.bf16.mxu0 %v392_v1  ;;  %v357_v2 = vld [vmem:[%s487_s1] sm:$0xff]   ;;  %327 = vmatprep.subr.bf16.mxu1 %v392_v1  ;;  %v358_v4 = vld [vmem:[%s489_s3 + $0x38] sm:$0xff]  }
   0x2   :  { %320 = vmatpush3.bf16.msra.mxu0 %v356_v0  ;;  %323 = vmatprep.mubr.msk.bf16.mxu0 %vm393_vm0, %v392_v1  ;;  %v29_v3 = vld [vmem:[%s486_s0] sm:$0xff]  ;;  %v359_v6 = vld [vmem:[%s489_s3 + $0x30] sm:$0xff]   ;;  %v360_v7 = vld [vmem:[%s489_s3 + $0x28] sm:$0xff]  }
   0x3   :  { %321 = vmatprep.subr.bf16.mxu0 %v392_v1  ;;  %343 = vmatprep.mubr.msk.bf16.mxu1 %vm393_vm0, %v392_v1  ;;  %v30_v5 = vpack.c.bf16 %v29_v3, %v29_v3 }
   0x4   :  { %328 = vmatpush3.bf16.msra.mxu1 %v358_v4 }
   0x5   :  { %329 = vmatprep.subr.bf16.mxu1 %v392_v1 }
   0x6   :  { %322 = vmatpush3.bf16.msra.mxu0 %v357_v2 }
   0x7   :  { %347 = vmatprep.subr.bf16.mxu0 %v392_v1 }
   0x8   :  { %330 = vmatpush3.bf16.msra.mxu1 %v359_v6 }
   0x9   :  { %324 = vmatmul.mubr.msk.bf16.vlgmr.msra.gmra.mxu0 %vm54_vm1, %v30_v5  ;;  %331 = vmatprep.subr.bf16.mxu1 %v392_v1 }
   0xa   :  { %349 = vmatprep.mubr.msk.bf16.mxu0 %vm393_vm0, %v392_v1 }
   0xb   :  { %13 = vsyncpa [#allocation4], 0  ;;  %v361_v8 = vld [vmem:[%s489_s3 + $0x20] sm:$0xff]   ;;  %v362_v9 = vld [vmem:[%s489_s3 + $0x18] sm:$0xff]   ;;  %vm218_vm4 = vcmask 523264   ;;  %v266_v33 = vstv %s492_s6  ;;  %vm274_vm5 = vcmask 57344  }
   0xc   :  { %332 = vmatpush3.bf16.msra.mxu1 %v360_v7  ;;  %v363_v10 = vld [vmem:[%s489_s3 + $0x10] sm:$0xff]   ;;  %v364_v11 = vld [vmem:[%s489_s3 + $0x8] sm:$0xff]   ;;  %v365_v12 = vld [vmem:[%s489_s3] sm:$0xff]  }
   0xd   :  { %333 = vmatprep.subr.bf16.mxu1 %v392_v1  ;;  %v290_v13 = vld [vmem:[%s488_s2] ss:$0 sm:$0xff] }
   0xe   :  { %v294_v22 = vld [vmem:[%s490_s4] ss:$0 sm:$0xff]  ;;  %s394_s4 = smov [#allocation3]  }
   0xf   :  { %v216_v32 = vld [vmem:[%s491_s5] sm:$0xf]  ;;  %s282_s27 = sshll.u32 %s394_s4, 4  ;;  %s283_s27 = int_to_ptr.vmem [resolvable:$true] %s282_s27 }
  0x10   :  { %334 = vmatpush3.bf16.msra.mxu1 %v361_v8  ;;  %s370_s5 = scalar_lea.vmem %s283_s27, 16  ;;  %s374_s28 = scalar_lea.vmem %s283_s27, 32 }
  0x11   :  { %335 = vmatprep.subr.bf16.mxu1 %v392_v1  ;;  %p371_p0 = scmp.ne.s32.totalorder %s283_s27, %s370_s5  ;;  %p375_p1 = scmp.lt.s32.totalorder %s283_s27, %s283_s27 }
  0x12   :  { %p376_p2 = scmp.lt.s32.totalorder %s374_s28, %s370_s5 }
  0x14   :  { %336 = vmatpush3.bf16.msra.mxu1 %v362_v9  ;;  %p377_p3 = por %p376_p2, %p375_p1 }
  0x15   :  { %337 = vmatprep.subr.bf16.mxu1 %v392_v1 }
  0x16   :  { %p378_p4 = pnand %p377_p3, %p371_p0 }
  0x18   :  { %338 = vmatpush3.bf16.msra.mxu1 %v363_v10 }
  0x19   :  { %339 = vmatprep.subr.bf16.mxu1 %v392_v1 }
  0x1c   :  { %340 = vmatpush3.bf16.msra.mxu1 %v364_v11 }
  0x1d   :  { %341 = vmatprep.subr.bf16.mxu1 %v392_v1 }
  0x20   :  { %342 = vmatpush3.bf16.msra.mxu1 %v365_v12 }
  0xc9   :  { %v92_v14 = vpop.f32.mrf.mxu0 }
  0xca   :  { %v93_v15 = vadd.f32 %v290_v13, %v92_v14 }
  0xcb   :  { %v325_v16 = vpop.f32.mrf.mxu0 }
  0xcc   :  { %vm98_vm2 = vcmp.gt.f32.partialorder %v93_v15, 0.0  ;;  %v99_v17 = vmul.f32 0.01, %v93_v15 }
  0xcd   :  { %v95_v18 = vpop.f32.mrf.mxu0 }
  0xce   :  { %v100_v19 = vsel %vm98_vm2, %v93_v15, %v99_v17 }
  0xcf   :  { %v326_v20 = vpop.f32.mrf.mxu0  ;;  %v101_v21 = vpack.c.bf16 %v100_v19, %v100_v19 }
  0xd1   :  { %344 = vmatmul.mubr.bf16.vlgmr.msra.gmra.mxu1 %v101_v21 }
 0x191   :  { %v207_v23 = vpop.f32.mrf.mxu1 }
 0x192   :  { %v208_v24 = vadd.f32 %v294_v22, %v207_v23 }
 0x193   :  { %v345_v25 = vpop.f32.mrf.mxu1 }
 0x194   :  { %vm213_vm3 = vcmp.gt.f32.partialorder %v208_v24, 0.0  ;;  %v214_v26 = vmul.f32 0.01, %v208_v24 }
 0x195   :  { %v210_v27 = vpop.f32.mrf.mxu1 }
 0x196   :  { %v215_v28 = vsel %vm213_vm3, %v208_v24, %v214_v26 }
 0x197   :  { %v217_v29 = vpack.c.bf16 %v215_v28, %v215_v28  ;;  %v346_v30 = vpop.f32.mrf.mxu1 }
 0x199   :  { %v223_v31 = vsel %vm218_vm4, %v217_v29, 0 }
 0x19a   :  { %348 = vmatpush3.bf16.xpose.msra.mxu0 %v223_v31 }
 0x1a1   :  { %350 = vmatmul.mubr.msk.bf16.vlgmr.msra.gmra.mxu0 %vm218_vm4, %v216_v32 }
 0x261   :  { %v259_v34 = vpop.f32.mrf.mxu0 }
 0x262   :  { %v267_v35 = vadd.f32 %v266_v33, %v259_v34 }
 0x263   :  { %v351_v36 = vpop.f32.mrf.mxu0 }
 0x264   :  { %v304_v37 = vmul.f32 -1.442695, %v267_v35 }
 0x265   :  { %v262_v38 = vpop.f32.mrf.mxu0 }
 0x266   :  { %366 = vpow2.f32 %v304_v37 }
 0x267   :  { %v352_v39 = vpop.f32.mrf.mxu0 }
 0x273   :  { %v367_v40 = vpop.eup %366 }
 0x274   :  { %v271_v41 = vadd.f32 1.0, %v367_v40 }
 0x276   :  { %368 = vrcp.f32 %v271_v41 }
 0x283   :  { %v369_v42 = vpop.eup %368 }
 0x284   :  { %275 = vst.msk [vmem:[#allocation3] sm:$0x1] %vm274_vm5, %v369_v42 }
 0x285   :  { %381 = shalt.err (!%p378_p4)
}
 0x286   :  { %285 = dma.vmem_to_hbm [thread:$0]  %s283_s27, 16, %s493_s7, [#allocation4]  }
 0x287   :  { %390 = dma.done.wait [#allocation4], 16  }
 0x288   :  { %391 = vsyncadd [#allocation4], 4294967280 }
 0x289   :  { %289 = vsyncpa [#allocation4], 1 }

</bundles_post_ra>
